<compile_context>
chip_gen: v5e
topology: v5e:2x2
jax: 0.10.0
libtpu: 0.0.40
codegen_flags: <defaults>
</compile_context>

<pallas_src>
import functools

import jax
import jax.numpy as jnp
from jax.experimental import pallas as pl
from jax.experimental.pallas import tpu as pltpu

EPS = 1e-5                 # nn.BatchNorm2d default
MXU_DTYPE = jnp.bfloat16   # matmul operand dtype (accumulation is f32)


def _two_conv_block_kernel(x_ref, bn_ref, w_ref, o_ref, *, W):
    """One batch image per grid step.

    x_ref : (Cin, H*W)     f32   input image, spatial flattened row-major
    bn_ref: (Cin, 4)       f32   columns = (scale1, shift1, scale2, shift2)
    w_ref : (Cout, 10*Cin) bf16  [ conv1 1x1 | conv2 3x3 taps (ky, kx, ci) ]
    o_ref : (Cout, H*W)    f32
    """
    x = x_ref[...]
    Cin, P = x.shape

    s1 = bn_ref[:, 0:1]
    t1 = bn_ref[:, 1:2]
    s2 = bn_ref[:, 2:3]
    t2 = bn_ref[:, 3:4]

    # Folded BN + ReLU, f32 on the VPU (lane-dense: P on the 128-lane axis).
    h1 = jnp.maximum(x * s1 + t1, 0.0)              # (Cin, P)
    h2 = jnp.maximum(x * s2 + t2, 0.0)              # (Cin, P)

    # Zero-pad h2 by (W+1) on both ends of the flat spatial axis: every 3x3
    # tap (dy, dx) then becomes a static contiguous slice.  Vertical
    # out-of-range falls into the pad; horizontal wrap across rows is masked.
    zpad = jnp.zeros((Cin, W + 1), dtype=h2.dtype)
    hp = jnp.concatenate([zpad, h2, zpad], axis=1)  # (Cin, P + 2W + 2)

    col = jax.lax.broadcasted_iota(jnp.int32, (Cin, P), 1) % W
    m_left = col >= 1           # x - 1 in range (dx = -1)
    m_right = col <= W - 2      # x + 1 in range (dx = +1)

    parts = [h1]                                    # 1x1 branch (K = Cin)
    for dy in (-1, 0, 1):                           # 3x3 branch (K = 9*Cin)
        for dx in (-1, 0, 1):
            start = (W + 1) + dy * W + dx
            tap = hp[:, start:start + P]            # h2[y+dy, x+dx] flattened
            if dx == -1:
                tap = jnp.where(m_left, tap, 0.0)
            elif dx == 1:
                tap = jnp.where(m_right, tap, 0.0)
            parts.append(tap)
    patches = jnp.concatenate(parts, axis=0).astype(w_ref.dtype)  # (10*Cin, P)

    # Single MXU matmul covering both branches; f32 accumulation; lane-dense
    # store to the output tile.
    o_ref[...] = jnp.dot(w_ref[...], patches,
                         preferred_element_type=jnp.float32).astype(o_ref.dtype)


def two_conv_block(x, w1, w2, g1, b1, g2, b2):
    """Forward pass of TwoConvBlock (training-mode BatchNorm).

    x : (N, Cin, H, W) f32 (PyTorch NCHW)
    w1: (Cout, Cin)         conv1 weight (1x1, bias-free)
    w2: (Cout, Cin, 3, 3)   conv2 weight (3x3, pad=1, bias-free, OIHW)
    g*, b*: (Cin,)          BatchNorm affine parameters
    returns (N, Cout, H, W) f32
    """
    N, Cin, H, W = x.shape
    Cout = w1.shape[0]
    P = H * W
    xf = x.astype(jnp.float32)

    # --- BN batch-statistics pre-pass (plain-JAX, one fused HBM read). ------
    mean = jnp.mean(xf, axis=(0, 2, 3))
    mean_sq = jnp.mean(xf * xf, axis=(0, 2, 3))
    var = jnp.maximum(mean_sq - mean * mean, 0.0)   # biased (training-mode)
    rstd = jax.lax.rsqrt(var + EPS)
    # Fold BN affine:  relu(xhat * g + b) == relu(x * scale + shift)
    scale1 = g1 * rstd
    shift1 = b1 - mean * scale1
    scale2 = g2 * rstd
    shift2 = b2 - mean * scale2
    bn = jnp.stack([scale1, shift1, scale2, shift2], axis=1)      # (Cin, 4)
    # TODO(synk): BatchNorm running-stat buffer updates are a training-time
    # side effect with no influence on this forward output; not reproduced.

    # --- im2col weight: [1x1 | 3x3 taps, (ky, kx, ci) column order]. --------
    w2_cols = jnp.transpose(w2, (0, 2, 3, 1)).reshape(Cout, 9 * Cin)
    wmat = jnp.concatenate([w1, w2_cols], axis=1).astype(MXU_DTYPE)

    x_flat = xf.reshape(N, Cin, P)      # free: NCHW is row-major contiguous

    kernel = functools.partial(_two_conv_block_kernel, W=W)
    out_flat = pl.pallas_call(
        kernel,
        out_shape=jax.ShapeDtypeStruct((N, Cout, P), jnp.float32),
        grid=(N,),
        in_specs=[
            pl.BlockSpec((None, Cin, P), lambda n: (n, 0, 0)),    # image n
            pl.BlockSpec((Cin, 4), lambda n: (0, 0)),             # BN params
            pl.BlockSpec((Cout, 10 * Cin), lambda n: (0, 0)),     # weights
        ],
        out_specs=pl.BlockSpec((None, Cout, P), lambda n: (n, 0, 0)),
        compiler_params=pltpu.CompilerParams(
            dimension_semantics=("parallel",),   # megacore / v7x 2-TC sharding
            vmem_limit_bytes=32 * 1024 * 1024,   # explicit; safe on v7x 64 MiB
        ),
    )(x_flat, bn, wmat)

    return out_flat.reshape(N, Cout, H, W)


def reference(x, w1, w2, g1, b1, g2, b2):
    """Plain-JAX f32 reference with PyTorch TwoConvBlock semantics (NCHW)."""
    xf = x.astype(jnp.float32)
    mean = jnp.mean(xf, axis=(0, 2, 3), keepdims=True)
    var = jnp.mean((xf - mean) ** 2, axis=(0, 2, 3), keepdims=True)
    xhat = (xf - mean) * jax.lax.rsqrt(var + EPS)
    h1 = jnp.maximum(xhat * g1.reshape(1, -1, 1, 1) + b1.reshape(1, -1, 1, 1), 0.0)
    h2 = jnp.maximum(xhat * g2.reshape(1, -1, 1, 1) + b2.reshape(1, -1, 1, 1), 0.0)
    dn = ("NCHW", "OIHW", "NCHW")
    Cout, Cin = w1.shape
    o1 = jax.lax.conv_general_dilated(h1, w1.reshape(Cout, Cin, 1, 1),
                                      (1, 1), "VALID", dimension_numbers=dn)
    o2 = jax.lax.conv_general_dilated(h2, w2, (1, 1), ((1, 1), (1, 1)),
                                      dimension_numbers=dn)
    return o1 + o2


if __name__ == "__main__":
    N, Cin, Cout, H, W = 2, 4, 8, 16, 16
    key = jax.random.PRNGKey(0)
    kx, k1, k2, kg1, kb1, kg2, kb2 = jax.random.split(key, 7)

    x = jax.random.normal(kx, (N, Cin, H, W), dtype=jnp.float32)
    # Deterministic synthetic parameters (orthogonal init is init-time only
    # and does not affect forward semantics).
    w1 = jax.random.normal(k1, (Cout, Cin), dtype=jnp.float32) * 0.2
    w2 = jax.random.normal(k2, (Cout, Cin, 3, 3), dtype=jnp.float32) * 0.1
    g1 = 1.0 + 0.1 * jax.random.normal(kg1, (Cin,), dtype=jnp.float32)
    b1 = 0.1 * jax.random.normal(kb1, (Cin,), dtype=jnp.float32)
    g2 = 1.0 + 0.1 * jax.random.normal(kg2, (Cin,), dtype=jnp.float32)
    b2 = 0.1 * jax.random.normal(kb2, (Cin,), dtype=jnp.float32)

    out = jax.block_until_ready(jax.jit(two_conv_block)(x, w1, w2, g1, b1, g2, b2))
    ref = jax.block_until_ready(reference(x, w1, w2, g1, b1, g2, b2))

    assert out.shape == (N, Cout, H, W)
    err = float(jnp.max(jnp.abs(out - ref)))
    scale = float(jnp.max(jnp.abs(ref)))
    # bf16 MXU operands vs f32 reference -> small relative tolerance.
    assert err <= 3e-2 * max(1.0, scale), f"mismatch: max|err|={err}, max|ref|={scale}"
    print("KERNEL_OK")
</pallas_src>

<mosaic_0001>
module attributes {stable_mosaic.version = 11 : i64} {
  func.func @_two_conv_block_kernel(%arg0: i32, %arg1: memref<1x4x256xf32, #tpu.memory_space<vmem>>, %arg2: memref<4x4xf32, #tpu.memory_space<vmem>>, %arg3: memref<8x40xbf16, #tpu.memory_space<vmem>>, %arg4: memref<1x8x256xf32, #tpu.memory_space<vmem>>) attributes {dimension_semantics = [#tpu.dimension_semantics<parallel>], iteration_bounds = array<i64: 2>, scalar_prefetch = 0 : i64, scratch_operands = 0 : i64, tpu.core_type = #tpu.core_type<tc>, window_params = [{transform_indices = @transform_0, window_bounds = array<i64: 1, 4, 256>}, {pipeline_mode = #tpu.pipeline_mode<synchronous>, transform_indices = @transform_1, window_bounds = array<i64: 4, 4>}, {pipeline_mode = #tpu.pipeline_mode<synchronous>, transform_indices = @transform_2, window_bounds = array<i64: 8, 40>}, {transform_indices = @transform_3, window_bounds = array<i64: 1, 8, 256>}]} {
    %c0 = arith.constant 0 : index
    %c0_0 = arith.constant 0 : index
    %c0_1 = arith.constant 0 : index
    %0 = vector.load %arg1[%c0, %c0_0, %c0_1] : memref<1x4x256xf32, #tpu.memory_space<vmem>>, vector<1x4x256xf32>
    %1 = vector.shape_cast %0 : vector<1x4x256xf32> to vector<4x256xf32>
    %c0_2 = arith.constant 0 : index
    %c0_3 = arith.constant 0 : index
    %2 = vector.load %arg2[%c0_2, %c0_3] : memref<4x4xf32, #tpu.memory_space<vmem>>, vector<4x1xf32>
    %c0_4 = arith.constant 0 : index
    %c1 = arith.constant 1 : index
    %3 = vector.load %arg2[%c0_4, %c1] : memref<4x4xf32, #tpu.memory_space<vmem>>, vector<4x1xf32>
    %c0_5 = arith.constant 0 : index
    %c2 = arith.constant 2 : index
    %4 = vector.load %arg2[%c0_5, %c2] : memref<4x4xf32, #tpu.memory_space<vmem>>, vector<4x1xf32>
    %c0_6 = arith.constant 0 : index
    %c3 = arith.constant 3 : index
    %5 = vector.load %arg2[%c0_6, %c3] : memref<4x4xf32, #tpu.memory_space<vmem>>, vector<4x1xf32>
    %6 = vector.broadcast %2 : vector<4x1xf32> to vector<4x256xf32>
    %7 = arith.mulf %1, %6 : vector<4x256xf32>
    %8 = vector.broadcast %3 : vector<4x1xf32> to vector<4x256xf32>
    %9 = arith.addf %7, %8 : vector<4x256xf32>
    %cst = arith.constant 0.000000e+00 : f32
    %10 = vector.broadcast %cst : f32 to vector<4x256xf32>
    %11 = arith.maximumf %9, %10 : vector<4x256xf32>
    %12 = vector.broadcast %4 : vector<4x1xf32> to vector<4x256xf32>
    %13 = arith.mulf %1, %12 : vector<4x256xf32>
    %14 = vector.broadcast %5 : vector<4x1xf32> to vector<4x256xf32>
    %15 = arith.addf %13, %14 : vector<4x256xf32>
    %cst_7 = arith.constant 0.000000e+00 : f32
    %16 = vector.broadcast %cst_7 : f32 to vector<4x256xf32>
    %17 = arith.maximumf %15, %16 : vector<4x256xf32>
    %cst_8 = arith.constant 0.000000e+00 : f32
    %18 = vector.broadcast %cst_8 : f32 to vector<4x17xf32>
    %19 = tpu.concatenate %18, %17, %18 in 1 : vector<4x17xf32>, vector<4x256xf32>, vector<4x17xf32> -> vector<4x290xf32>
    %20 = tpu.iota {dimensions = array<i32: 1>} : vector<4x256xi32>
    %c16_i32 = arith.constant 16 : i32
    %c0_i32 = arith.constant 0 : i32
    %21 = arith.cmpi eq, %c16_i32, %c0_i32 : i32
    %c1_i32 = arith.constant 1 : i32
    %22 = arith.select %21, %c1_i32, %c16_i32 : i32
    %23 = vector.broadcast %22 : i32 to vector<4x256xi32>
    %24 = arith.remsi %20, %23 : vector<4x256xi32>
    %c0_i32_9 = arith.constant 0 : i32
    %25 = vector.broadcast %c0_i32_9 : i32 to vector<4x256xi32>
    %26 = arith.cmpi ne, %24, %25 : vector<4x256xi32>
    %c0_i32_10 = arith.constant 0 : i32
    %27 = vector.broadcast %c0_i32_10 : i32 to vector<4x256xi32>
    %28 = arith.cmpi slt, %24, %27 : vector<4x256xi32>
    %c0_i32_11 = arith.constant 0 : i32
    %29 = arith.cmpi slt, %22, %c0_i32_11 : i32
    %30 = vector.broadcast %29 : i1 to vector<4x256xi1>
    %31 = vector.broadcast %30 : vector<4x256xi1> to vector<4x256xi1>
    %32 = arith.xori %28, %31 : vector<4x256xi1>
    %33 = arith.andi %32, %26 : vector<4x256xi1>
    %34 = vector.broadcast %22 : i32 to vector<4x256xi32>
    %35 = arith.addi %24, %34 : vector<4x256xi32>
    %36 = arith.select %33, %35, %24 : vector<4x256xi1>, vector<4x256xi32>
    %c1_i32_12 = arith.constant 1 : i32
    %37 = vector.broadcast %c1_i32_12 : i32 to vector<4x256xi32>
    %38 = arith.cmpi sge, %36, %37 : vector<4x256xi32>
    %c14_i32 = arith.constant 14 : i32
    %39 = vector.broadcast %c14_i32 : i32 to vector<4x256xi32>
    %40 = arith.cmpi sle, %36, %39 : vector<4x256xi32>
    %41 = vector.extract_strided_slice %19 {offsets = [0, 0], sizes = [4, 256], strides = [1, 1]} : vector<4x290xf32> to vector<4x256xf32>
    %cst_13 = arith.constant 0.000000e+00 : f32
    %42 = vector.broadcast %cst_13 : f32 to vector<4x256xf32>
    %43 = arith.select %38, %41, %42 : vector<4x256xi1>, vector<4x256xf32>
    %44 = vector.extract_strided_slice %19 {offsets = [0, 1], sizes = [4, 256], strides = [1, 1]} : vector<4x290xf32> to vector<4x256xf32>
    %45 = vector.extract_strided_slice %19 {offsets = [0, 2], sizes = [4, 256], strides = [1, 1]} : vector<4x290xf32> to vector<4x256xf32>
    %cst_14 = arith.constant 0.000000e+00 : f32
    %46 = vector.broadcast %cst_14 : f32 to vector<4x256xf32>
    %47 = arith.select %40, %45, %46 : vector<4x256xi1>, vector<4x256xf32>
    %48 = vector.extract_strided_slice %19 {offsets = [0, 16], sizes = [4, 256], strides = [1, 1]} : vector<4x290xf32> to vector<4x256xf32>
    %cst_15 = arith.constant 0.000000e+00 : f32
    %49 = vector.broadcast %cst_15 : f32 to vector<4x256xf32>
    %50 = arith.select %38, %48, %49 : vector<4x256xi1>, vector<4x256xf32>
    %51 = vector.extract_strided_slice %19 {offsets = [0, 17], sizes = [4, 256], strides = [1, 1]} : vector<4x290xf32> to vector<4x256xf32>
    %52 = vector.extract_strided_slice %19 {offsets = [0, 18], sizes = [4, 256], strides = [1, 1]} : vector<4x290xf32> to vector<4x256xf32>
    %cst_16 = arith.constant 0.000000e+00 : f32
    %53 = vector.broadcast %cst_16 : f32 to vector<4x256xf32>
    %54 = arith.select %40, %52, %53 : vector<4x256xi1>, vector<4x256xf32>
    %55 = vector.extract_strided_slice %19 {offsets = [0, 32], sizes = [4, 256], strides = [1, 1]} : vector<4x290xf32> to vector<4x256xf32>
    %cst_17 = arith.constant 0.000000e+00 : f32
    %56 = vector.broadcast %cst_17 : f32 to vector<4x256xf32>
    %57 = arith.select %38, %55, %56 : vector<4x256xi1>, vector<4x256xf32>
    %58 = vector.extract_strided_slice %19 {offsets = [0, 33], sizes = [4, 256], strides = [1, 1]} : vector<4x290xf32> to vector<4x256xf32>
    %59 = vector.extract_strided_slice %19 {offsets = [0, 34], sizes = [4, 256], strides = [1, 1]} : vector<4x290xf32> to vector<4x256xf32>
    %cst_18 = arith.constant 0.000000e+00 : f32
    %60 = vector.broadcast %cst_18 : f32 to vector<4x256xf32>
    %61 = arith.select %40, %59, %60 : vector<4x256xi1>, vector<4x256xf32>
    %62 = tpu.concatenate %11, %43, %44, %47, %50, %51, %54, %57, %58, %61 in 0 : vector<4x256xf32>, vector<4x256xf32>, vector<4x256xf32>, vector<4x256xf32>, vector<4x256xf32>, vector<4x256xf32>, vector<4x256xf32>, vector<4x256xf32>, vector<4x256xf32>, vector<4x256xf32> -> vector<40x256xf32>
    %63 = arith.truncf %62 : vector<40x256xf32> to vector<40x256xbf16>
    %c0_19 = arith.constant 0 : index
    %c0_20 = arith.constant 0 : index
    %64 = vector.load %arg3[%c0_19, %c0_20] : memref<8x40xbf16, #tpu.memory_space<vmem>>, vector<8x40xbf16>
    %cst_21 = arith.constant dense<0.000000e+00> : vector<8x256xf32>
    %65 = tpu.matmul %64, %63, %cst_21 {dimension_numbers = #tpu.dot_dimension_numbers<[1], [0], [0], [1], [0, 0, 1, 1], [], []>} : vector<8x40xbf16>, vector<40x256xbf16>, vector<8x256xf32> -> vector<8x256xf32>
    %c0_22 = arith.constant 0 : index
    %c0_23 = arith.constant 0 : index
    %c0_24 = arith.constant 0 : index
    %66 = vector.load %arg4[%c0_22, %c0_23, %c0_24] : memref<1x8x256xf32, #tpu.memory_space<vmem>>, vector<1x8x256xf32>
    %67 = vector.shape_cast %66 : vector<1x8x256xf32> to vector<8x256xf32>
    %68 = vector.shape_cast %65 : vector<8x256xf32> to vector<1x8x256xf32>
    tpu.vector_store %arg4[%c0_22, %c0_23, %c0_24], %68 {strides = array<i32>} : memref<1x8x256xf32, #tpu.memory_space<vmem>>, vector<1x8x256xf32>,
    return
  }
  func.func @transform_0(%arg0: i32) -> (i32, i32, i32) {
    %c0_i32 = arith.constant 0 : i32
    %c0_i32_0 = arith.constant 0 : i32
    %c0_i32_1 = arith.constant 0 : i32
    return %arg0, %c0_i32, %c0_i32_0 : i32, i32, i32
  }
  func.func @transform_1(%arg0: i32) -> (i32, i32) {
    %c0_i32 = arith.constant 0 : i32
    %c0_i32_0 = arith.constant 0 : i32
    %c0_i32_1 = arith.constant 0 : i32
    return %c0_i32, %c0_i32_0 : i32, i32
  }
  func.func @transform_2(%arg0: i32) -> (i32, i32) {
    %c0_i32 = arith.constant 0 : i32
    %c0_i32_0 = arith.constant 0 : i32
    %c0_i32_1 = arith.constant 0 : i32
    return %c0_i32, %c0_i32_0 : i32, i32
  }
  func.func @transform_3(%arg0: i32) -> (i32, i32, i32) {
    %c0_i32 = arith.constant 0 : i32
    %c0_i32_0 = arith.constant 0 : i32
    %c0_i32_1 = arith.constant 0 : i32
    return %arg0, %c0_i32, %c0_i32_0 : i32, i32, i32
  }
}

</mosaic_0001>

<bundles_post_ra>
// kernel: two_conv_block.1
= control target key start
LH: loop header
LB: loop body
LE: loop exit
PB: predicated region body
PF: predicated region fallthrough
CT: control target
= control target key end

     0   :  { %s633_s12 = smov 0   ;;  %s734_s0 = inlined_call_operand.vmem [shape: f32[2,4,256], index: 0, kind: input, shape index: {}]   ;;  %s735_s1 = inlined_call_operand.vmem [shape: f32[4,4], index: 1, kind: input, shape index: {}]   ;;  %s736_s2 = inlined_call_operand.vmem [shape: bf16[8,40], index: 2, kind: input, shape index: {}]   ;;  %s737_s3 = inlined_call_operand.vmem [shape: f32[2,8,256], index: 3, kind: output, shape index: {}]  }
   0x1 LB: > { %s505_s13 = sadd.s32 4294967295, %s597_s12   ;;  %p509_p0 = scmp.ge.s32.totalorder %s597_s12, 1  ;;  %s597_s12 = sphi %s633_s12, %s13_s12  }
   0x2   : > { %p137_p1 = scmp.lt.s32.totalorder %s597_s12, 3 }
   0x4   : > { %p138_p2 = pnand %p509_p0, %p137_p1 }
   0x5   : > { %p161_p3 = scmp.lt.s32.totalorder (!%p138_p2), %s505_s13, 1  ;;  %s604_s20 = smov (!%p138_p2), 17  }
   0x6   : > { %141 = sbr.rel (%p138_p2) target bundleno = 562 (0x232), region = 32  ;;  %s605_s21 = smov (!%p138_p2), 95  }
   0x7   : > { %s606_s22 = smov (!%p138_p2), 94   ;;  %s607_s23 = smov (!%p138_p2), 112  }
   0x8   : > { %s608_s24 = smov (!%p138_p2), 96   ;;  %s609_s25 = smov (!%p138_p2), 110  }
   0x9   : > { %s610_s26 = smov (!%p138_p2), 126   ;;  %s611_s27 = smov (!%p138_p2), 111  }
   0xa   : > { %s612_s28 = smov (!%p138_p2), 127  }
   0xb   : > { %v173_v0 = vld [vmem:[%s735_s1] sm:$0xf]  ;;  %v599_v1 = vmov 2   ;;  %v600_v2 = vmov 3   ;;  %v601_v3 = vmov 0   ;;  %s747_s13 = smov (!%p161_p3, %s505_s13), 1  ;;  %v228_v37 = vlaneseq }
   0xc   : > { %542 = vset.pattern.permute.xlu0 %v599_v1  ;;  %549 = vset.pattern.permute.xlu1 %v601_v3  ;;  %v602_v4 = vmov 839922192   ;;  %s518_s16 = sshll.u32 %s747_s13, 3  ;;  %v603_v8 = vmov 1   ;;  %vm221_vm0 = vcmask 138240   ;;  %vm321_vm1 = vcmask 769024  }
   0xd   : > { %195 = vperm.xlu0 %542, %v173_v0   ;;  %v179_v5 = vunpack.c.l.s4 %v602_v4  ;;  %550 = vset.pattern.permute.xlu2 %v603_v8  ;;  %s165_s19 = scalar_lea.vmem %s734_s0, %s518_s16  ;;  %v229_v39 = vand.u32 127, %v228_v37  ;;  %vm383_vm3 = vcmask 777216   ;;  %vm394_vm4 = vcmask 1043456   ;;  %s519_s4 = sshll.u32 %s747_s13, 4 }
   0xe   : > { %185 = vperm.xlu2 %550, %v173_v0   ;;  %v172_v10 = vld [vmem:[%s165_s19] sm:$0xff]  ;;  %vm308_vm6 = vcmask 785408   ;;  %vm295_vm7 = vcmask 900096   ;;  %vm282_vm8 = vcmask 916480   ;;  %vm366_vm11 = vcmask 908288   ;;  %s170_s7 = scalar_lea.vmem %s737_s3, %s519_s4 }
   0xf   : > { %v180_v7 = vunpack.c.0.s8 %v179_v5  ;;  %v235_v42 = vand.u32 15, %v229_v39  ;;  %v230_v54 = vadd.s32 128, %v229_v39  ;;  %vm346_vm12 = vcmask 1039360  }
  0x10   : > { %vm269_vm13 = vcmask 1031168   ;;  %vm412_vm14 = vcmask 326656  }
  0x11   : > { %vm659_vm2 = vcmp.le.s32.totalorder %v235_v42, 14  ;;  %v242_v56 = vand.u32 15, %v230_v54  ;;  %vm678_vm9 = vcmp.ge.s32.totalorder %v235_v42, 1 }
  0x13   : > { %vm668_vm5 = vcmp.le.s32.totalorder %v242_v56, 14  ;;  %vm685_vm10 = vcmp.ge.s32.totalorder %v242_v56, 1 }
  0x15   : > { %543 = vset.pattern.permute.xlu0 %v600_v2 }
  0x16   : > { %204 = vperm.xlu0 %543, %v173_v0  }
  0x68   : > { %v186_v26 = vpop.permute.xlu2 %185 }
  0x69   : > { %v190_v29 = vperm.slane %v186_v26, %v180_v7 }
  0x7f   : > { %v196_v6 = vpop.permute.xlu0 %195 }
  0x80   : > { %v200_v9 = vperm.slane %v196_v6, %v180_v7 }
  0x82   : > { %v202_v12 = vmul.f32 %v200_v9, %v172_v10 }
  0x88   : > { %v205_v11 = vpop.permute.xlu0 %204 }
  0x89   : > { %v209_v13 = vperm.slane %v205_v11, %v180_v7 }
  0x8b   : > { %v211_v14 = vadd.f32 %v209_v13, %v202_v12 }
  0x8d   : > { %v212_v15 = vmax.f32 %v211_v14, 0.0 }
  0x8f   : > { %214 = vst [vmem:[#allocation1] ss:$2 sm:$0xff] %v212_v15 }
  0x96   : > { %v215_v16 = vld.sshfl [vmem:[#allocation1] sm:$0xff pattern:$0x75316420]  ;;  %v216_v17 = vld.sshfl [vmem:[#allocation1 + $0x8] sm:$0xff pattern:$0x75316420] }
  0x97   : > { %v544_v18 = vpack.i.bf16 %v216_v17, %v215_v16 }
  0x99   : > { %545 = vrot.lane.b32.xlu1 %v544_v18, %s604_s20 }
  0xa1   : > { %176 = vperm.xlu1 %549, %v173_v0  }
 0x10b   : > { %v546_v19 = vpop.permute.xlu1 %545 }
 0x10c   : > { %v548_v20 = vunpack.i.h.bf16 %v546_v19  ;;  %v547_v21 = vunpack.i.l.bf16 %v546_v19 }
 0x10e   : > { %v227_v22 = vsel %vm221_vm0, %v548_v20, 0.0  ;;  %v650_v23 = vsel %vm221_vm0, %v547_v21, %v548_v20  ;;  %v652_v24 = vsel %vm221_vm0, 0.0, %v547_v21 }
 0x10f   : > { %381 = vrot.lane.b32.xlu0 %v227_v22, %s605_s21  ;;  %319 = vrot.lane.b32.xlu1 %v227_v22, %s606_s22  ;;  %v551_v25 = vpack.i.bf16 %v650_v23, %v652_v24  ;;  %v357_v33 = vrot.slane %v652_v24, 4  ;;  %v358_v34 = vrot.slane %v650_v23, 4  ;;  %v359_v36 = vrot.slane %v227_v22, 4 }
 0x110   : > { %v259_v26 = vsel %vm678_vm9, %v652_v24, 0.0  ;;  %v260_v44 = vsel %vm685_vm10, %v650_v23, 0.0 }
 0x111   : > { %552 = vrot.lane.b32.xlu2 %v551_v25, %s606_s22  ;;  %v581_v35 = vpack.i.bf16 %v358_v34, %v357_v33  ;;  %v336_v54 = vrot.slane %v259_v26, 4 }
 0x113   : > { %v177_v27 = vpop.permute.xlu1 %176 }
 0x114   : > { %v181_v28 = vperm.slane %v177_v27, %v180_v7 }
 0x116   : > { %v183_v30 = vmul.f32 %v181_v28, %v172_v10 }
 0x117   : > { %567 = vrot.lane.b32.xlu0 %v551_v25, %s607_s23  ;;  %562 = vrot.lane.b32.xlu1 %v551_v25, %s608_s24 }
 0x118   : > { %v192_v31 = vadd.f32 %v190_v29, %v183_v30 }
 0x119   : > { %557 = vrot.lane.b32.xlu2 %v551_v25, %s605_s21 }
 0x11a   : > { %v193_v32 = vmax.f32 %v192_v31, 0.0 }
 0x11c   : > { %329 = vst [vmem:[#allocation1] ss:$2 sm:$0xff] %v193_v32 }
 0x11f   : > { %293 = vrot.lane.b32.xlu0 %v227_v22, %s609_s25  ;;  %280 = vrot.lane.b32.xlu1 %v227_v22, %s607_s23 }
 0x121   : > { %306 = vrot.lane.b32.xlu2 %v227_v22, %s608_s24 }
 0x127   : > { %577 = vrot.lane.b32.xlu0 %v551_v25, %s610_s26  ;;  %582 = vrot.lane.b32.xlu1 %v581_v35, %s611_s27 }
 0x129   : > { %572 = vrot.lane.b32.xlu2 %v551_v25, %s609_s25 }
 0x12f   : > { %344 = vrot.lane.b32.xlu0 %v227_v22, %s612_s28  ;;  %267 = vrot.lane.b32.xlu1 %v227_v22, %s610_s26 }
 0x131   : > { %364 = vrot.lane.b32.xlu2 %v359_v36, %s611_s27 }
 0x139   : > { %587 = vrot.lane.b32.xlu2 %v551_v25, %s612_s28 }
 0x16b   : > { %v553_v38 = vpop.permute.xlu2 %552 }
 0x16c   : > { %v555_v40 = vunpack.i.h.bf16 %v553_v38  ;;  %v554_v41 = vunpack.i.l.bf16 %v553_v38 }
 0x16e   : > { %v322_v43 = vsel %vm321_vm1, %v554_v41, %v555_v40 }
 0x16f   : > { %v326_v45 = vsel %vm659_vm2, %v322_v43, 0.0 }
 0x170   : > { %v390_v49 = vrot.slane %v326_v45, 4 }
 0x173   : > { %v558_v46 = vpop.permute.xlu2 %557 }
 0x174   : > { %v560_v47 = vunpack.i.h.bf16 %v558_v46  ;;  %v559_v48 = vunpack.i.l.bf16 %v558_v46 }
 0x176   : > { %v384_v50 = vsel %vm383_vm3, %v559_v48, %v560_v47 }
 0x177   : > { %v403_v51 = vsel %vm394_vm4, %v384_v50, %v390_v49 }
 0x178   : > { %v409_v52 = vpack.c.bf16 %v403_v51, %v403_v51  ;;  %v330_v51 = vld.sshfl [vmem:[#allocation1] sm:$0xff pattern:$0x75316420] }
 0x17a   : > { %v417_v53 = vsel %vm394_vm4, %v409_v52, 0 }
 0x17b   : > { %v307_v55 = vpop.permute.xlu2 %306  ;;  %427 = vmatpush.bf16.msra.mxu0 %v417_v53 }
 0x181   : > { %v382_v58 = vpop.permute.xlu0 %381  ;;  %v320_v59 = vpop.permute.xlu1 %319 }
 0x182   : > { %v323_v60 = vsel %vm321_vm1, %v555_v40, %v320_v59  ;;  %v385_v0 = vsel %vm383_vm3, %v560_v47, %v382_v58  ;;  %v395_v58 = vsel %vm394_vm4, %v330_v51, %v336_v54 }
 0x183   : > { %v327_v61 = vsel %vm668_vm5, %v323_v60, 0.0  ;;  %v573_v63 = vpop.permute.xlu2 %572 }
 0x184   : > { %v391_v62 = vrot.slane %v327_v61, 4  ;;  %v575_v12 = vunpack.i.h.bf16 %v573_v63  ;;  %v574_v13 = vunpack.i.l.bf16 %v573_v63 }
 0x186   : > { %v404_v1 = vsel %vm394_vm4, %v385_v0, %v391_v62  ;;  %v296_v21 = vsel %vm295_vm7, %v574_v13, %v575_v12 }
 0x187   : > { %v410_v2 = vpack.c.bf16 %v404_v1, %v404_v1  ;;  %v300_v24 = vsel %vm659_vm2, %v296_v21, 0.0  ;;  %v331_v1 = vld.sshfl [vmem:[#allocation1 + $0x8] sm:$0xff pattern:$0x75316420] }
 0x189   : > { %v568_v3 = vpop.permute.xlu0 %567  ;;  %v563_v4 = vpop.permute.xlu1 %562  ;;  %v420_v5 = vsel %vm394_vm4, %v410_v2, 0 }
 0x18a   : > { %440 = vmatpush.bf16.msra.mxu1 %v420_v5  ;;  %v565_v6 = vunpack.i.h.bf16 %v563_v4  ;;  %v564_v7 = vunpack.i.l.bf16 %v563_v4  ;;  %v570_v14 = vunpack.i.h.bf16 %v568_v3  ;;  %v569_v15 = vunpack.i.l.bf16 %v568_v3  ;;  %v411_v3 = vld [vmem:[%s736_s2] sm:$0xf] }
 0x18b   : > { %v365_v8 = vpop.permute.xlu2 %364  ;;  %v337_v4 = vrot.slane %v260_v44, 4 }
 0x18c   : > { %v309_v9 = vsel %vm308_vm6, %v564_v7, %v565_v6  ;;  %v310_v18 = vsel %vm308_vm6, %v565_v6, %v307_v55  ;;  %v283_v20 = vsel %vm282_vm8, %v569_v15, %v570_v14 }
 0x18d   : > { %v313_v17 = vsel %vm678_vm9, %v309_v9, 0.0  ;;  %v314_v28 = vsel %vm685_vm10, %v310_v18, 0.0  ;;  %v287_v33 = vsel %vm678_vm9, %v283_v20, 0.0  ;;  %v396_v23 = vsel %vm394_vm4, %v331_v1, %v337_v4 }
 0x18e   : > { %v373_v25 = vrot.slane %v313_v17, 4  ;;  %v374_v41 = vrot.slane %v314_v28, 4 }
 0x190   : > { %v401_v40 = vsel %vm394_vm4, %v300_v24, %v373_v25 }
 0x191   : > { %v294_v10 = vpop.permute.xlu0 %293  ;;  %v281_v11 = vpop.permute.xlu1 %280 }
 0x192   : > { %v297_v19 = vsel %vm295_vm7, %v575_v12, %v294_v10  ;;  %v284_v30 = vsel %vm282_vm8, %v570_v14, %v281_v11 }
 0x193   : > { %v588_v27 = vpop.permute.xlu2 %587  ;;  %v301_v29 = vsel %vm668_vm5, %v297_v19, 0.0  ;;  %v288_v42 = vsel %vm685_vm10, %v284_v30, 0.0 }
 0x194   : > { %v590_v38 = vunpack.i.h.bf16 %v588_v27  ;;  %v589_v39 = vunpack.i.l.bf16 %v588_v27  ;;  %v402_v49 = vsel %vm394_vm4, %v301_v29, %v374_v41 }
 0x196   : > { %v347_v56 = vsel %vm346_vm12, %v589_v39, %v590_v38 }
 0x199   : > { %v578_v31 = vpop.permute.xlu0 %577  ;;  %v583_v32 = vpop.permute.xlu1 %582 }
 0x19a   : > { %v580_v34 = vunpack.i.h.bf16 %v578_v31  ;;  %v579_v35 = vunpack.i.l.bf16 %v578_v31  ;;  %v585_v36 = vunpack.i.h.bf16 %v583_v32  ;;  %v584_v37 = vunpack.i.l.bf16 %v583_v32 }
 0x19c   : > { %v367_v43 = vsel %vm366_vm11, %v584_v37, %v585_v36  ;;  %v368_v45 = vsel %vm366_vm11, %v585_v36, %v365_v8  ;;  %v270_v46 = vsel %vm269_vm13, %v579_v35, %v580_v34 }
 0x19d   : > { %v399_v47 = vsel %vm394_vm4, %v287_v33, %v367_v43  ;;  %v400_v48 = vsel %vm394_vm4, %v288_v42, %v368_v45  ;;  %v274_v50 = vsel %vm659_vm2, %v270_v46, 0.0 }
 0x19e   : > { %v407_v52 = vpack.c.bf16 %v401_v40, %v399_v47  ;;  %v408_v53 = vpack.c.bf16 %v402_v49, %v400_v48  ;;  %v353_v55 = vrot.slane %v274_v50, 4 }
 0x1a0   : > { %428 = vmatpush.bf16.msra.mxu0 %v407_v52  ;;  %441 = vmatpush.bf16.msra.mxu1 %v408_v53  ;;  %v397_v59 = vsel %vm394_vm4, %v347_v56, %v353_v55 }
 0x1a1   : > { %v268_v60 = vpop.permute.xlu1 %267  ;;  %v405_v61 = vpack.c.bf16 %v397_v59, %v395_v58  ;;  %v345_v62 = vpop.permute.xlu0 %344 }
 0x1a2   : > { %v271_v63 = vsel %vm269_vm13, %v580_v34, %v268_v60  ;;  %v348_v5 = vsel %vm346_vm12, %v590_v38, %v345_v62 }
 0x1a3   : > { %v275_v0 = vsel %vm668_vm5, %v271_v63, 0.0 }
 0x1a4   : > { %v354_v2 = vrot.slane %v275_v0, 4  ;;  %429 = vmatpush.bf16.msra.mxu0 %v405_v61 }
 0x1a6   : > { %v398_v6 = vsel %vm394_vm4, %v348_v5, %v354_v2 }
 0x1a7   : > { %514 = vmatmul.msk.bf16.vlgmr.msra.gmra.mxu0 %vm412_vm14, %v411_v3  ;;  %v406_v7 = vpack.c.bf16 %v398_v6, %v396_v23 }
 0x1a9   : > { %442 = vmatpush.bf16.msra.mxu1 %v406_v7 }
 0x1ac   : > { %515 = vmatmul.msk.bf16.vlgmr.msra.gmra.mxu1 %vm412_vm14, %v411_v3 }
 0x224   : > { %v431_v57 = vpop.f32.mrf.mxu0 }
 0x225   : > { %448 = vst [vmem:[%s170_s7] sm:$0xff] %v431_v57 }
 0x229   : > { %v444_v8 = vpop.f32.mrf.mxu1 }
 0x22a   : > { %449 = vst [vmem:[%s170_s7 + $0x8] sm:$0xff] %v444_v8 }
 0x22c   : > { %v433_v9 = vpop.f32.mrf.mxu0 }
 0x231   : > { %v446_v10 = vpop.f32.mrf.mxu1 }
 0x232 PF: > { %s13_s12 = sadd.s32 1, %s597_s12  }
 0x233   : > { %p10_p4 = scmp.ge.s32.totalorder %s13_s12, 4  }
 0x235   :  { %12 = sbr.rel (!%p10_p4) target bundleno = 1 (0x1), region = 62 }

</bundles_post_ra>
